<compile_context>
chip_gen: v5e
topology: v5e:2x2
jax: 0.10.0
libtpu: 0.0.40
codegen_flags: <defaults>
</compile_context>

<pallas_src>
import math

import jax
import jax.numpy as jnp
from jax.experimental import pallas as pl
from jax.experimental.pallas import tpu as pltpu  # noqa: F401  (TPU-specific tuning hooks)


def magic_kernel(x_ref, wq_ref, wk_ref, wv_ref, bq_ref, bk_ref, bv_ref, o_ref):
    """Fused single-head self-attention over the whole (B, S, D) input.

    Single grid point: every operand is resident in VMEM for the call.
      x_ref:            (B, S, D)  input
      wq_ref/wk_ref/wv_ref: (D, D) pre-transposed projection weights
                                   (W_Q already carries the 1/sqrt(D) scale)
      bq_ref/bk_ref/bv_ref: (1, D) biases (b_Q already scaled)
      o_ref:            (B, S, D)  output
    """
    B, S, D = x_ref.shape

    # Project ALL B*S rows at once: (B*S, D) @ (D, D).  Collapsing the two
    # leading dims keeps the minor (lane) dim untouched, so the reshape is a
    # layout no-op.  Three separate dots -> no lane-unaligned slicing of a
    # fused qkv result.
    x_all = x_ref[...].reshape(B * S, D).astype(jnp.float32)            # (B*S, D)

    q_all = jnp.dot(x_all, wq_ref[...],
                    preferred_element_type=jnp.float32) + bq_ref[...]   # (B*S, D)
    k_all = jnp.dot(x_all, wk_ref[...],
                    preferred_element_type=jnp.float32) + bk_ref[...]
    v_all = jnp.dot(x_all, wv_ref[...],
                    preferred_element_type=jnp.float32) + bv_ref[...]

    q = q_all.reshape(B, S, D)
    k = k_all.reshape(B, S, D)
    v = v_all.reshape(B, S, D)

    # attn_scores = (Q / sqrt(D)) @ K^T  (scale was folded into W_Q, b_Q at init)
    scores = jnp.einsum("bqd,bkd->bqk", q, k,
                        preferred_element_type=jnp.float32)             # (B, S, S)

    # Numerically-stable softmax with deferred normalization.
    m = jnp.max(scores, axis=-1, keepdims=True)                         # (B, S, 1)
    e = jnp.exp(scores - m)                                             # (B, S, S)
    s = jnp.sum(e, axis=-1, keepdims=True)                              # (B, S, 1)

    out = jnp.einsum("bqk,bkd->bqd", e, v,
                     preferred_element_type=jnp.float32)                # (B, S, D)

    # True EUP reciprocal (vrcp) + one Newton step (two cheap VPU ops) to keep
    # the result within 1e-5 of the exact divide.
    r = pl.reciprocal(s, approx=True)
    r = r * (2.0 - s * r)

    # Single coalesced store of the whole output.
    o_ref[...] = (out * r).astype(o_ref.dtype)


def magic_init_params(wq, bq, wk, bk, wv, bv):
    """One-time parameter prep (mirrors nn.Module.__init__).

    Runs ONCE at init, not per forward call: pre-transposes the PyTorch
    (out, in) Linear weights for `x @ W^T`, folds the 1/sqrt(D) attention
    scale into the Q projection, and shapes biases as (1, D).
    """
    D = wq.shape[0]
    scale = 1.0 / math.sqrt(D)
    return {
        "wq_t": wq.T * scale,                 # (D, D), pre-scaled
        "wk_t": wk.T,                         # (D, D)
        "wv_t": wv.T,                         # (D, D)
        "bq": (bq * scale).reshape(1, D),     # (1, D), pre-scaled
        "bk": bk.reshape(1, D),
        "bv": bv.reshape(1, D),
    }


def magic_forward(x, params):
    """Per-call wrapper: exactly one op (the pallas_call), no weight prep.

    x: (B, S, D) float32; params: output of magic_init_params.
    """
    B, S, D = x.shape

    # TODO(synk): D = 9 leaves every vreg / MXU pass / store at <8% lane
    # utilization; recovering that (and using both v7x TensorCores) requires
    # batching many heads/layers per pallas_call with a parallel grid axis and
    # padding D toward 128 at the call site, not inside this kernel.

    # No grid: one invocation, whole arrays mapped into VMEM (total footprint
    # is a few KiB), so there is no per-grid-step overhead.
    return pl.pallas_call(
        magic_kernel,
        out_shape=jax.ShapeDtypeStruct((B, S, D), x.dtype),
    )(x, params["wq_t"], params["wk_t"], params["wv_t"],
      params["bq"], params["bk"], params["bv"])


def magic_reference(x, wq, bq, wk, bk, wv, bv):
    """Pure-JAX reference matching the PyTorch module exactly."""
    q = x @ wq.T + bq
    k = x @ wk.T + bk
    v = x @ wv.T + bv
    scores = jnp.einsum("bqd,bkd->bqk", q, k) / math.sqrt(q.shape[-1])
    probs = jax.nn.softmax(scores, axis=-1)
    return jnp.einsum("bqk,bkd->bqd", probs, v)


if __name__ == "__main__":
    B, S, D = 2, 8, 9  # D = 9 per the module's Linear(9, 9)

    key = jax.random.PRNGKey(0)
    kx, kq, kk, kv, kbq, kbk, kbv = jax.random.split(key, 7)

    x = jax.random.normal(kx, (B, S, D), dtype=jnp.float32)

    # Deterministic parameter init mimicking torch.nn.Linear's U(-1/sqrt(in), 1/sqrt(in))
    bound = 1.0 / math.sqrt(D)
    wq = jax.random.uniform(kq, (D, D), jnp.float32, -bound, bound)
    wk = jax.random.uniform(kk, (D, D), jnp.float32, -bound, bound)
    wv = jax.random.uniform(kv, (D, D), jnp.float32, -bound, bound)
    bq = jax.random.uniform(kbq, (D,), jnp.float32, -bound, bound)
    bk = jax.random.uniform(kbk, (D,), jnp.float32, -bound, bound)
    bv = jax.random.uniform(kbv, (D,), jnp.float32, -bound, bound)

    # Init-time prep (once), then a prep-free forward call.
    params = magic_init_params(wq, bq, wk, bk, wv, bv)
    params = jax.tree_util.tree_map(jax.block_until_ready, params)

    out = magic_forward(x, params)
    out = jax.block_until_ready(out)

    ref = magic_reference(x, wq, bq, wk, bk, wv, bv)
    assert out.shape == (B, S, D)
    assert jnp.allclose(out, ref, atol=1e-5, rtol=1e-5), "mismatch vs reference"

    print("KERNEL_OK")
</pallas_src>

<mosaic_0001>
module attributes {stable_mosaic.version = 11 : i64} {
  func.func @magic_kernel(%arg0: memref<2x8x9xf32, #tpu.memory_space<vmem>>, %arg1: memref<9x9xf32, #tpu.memory_space<vmem>>, %arg2: memref<9x9xf32, #tpu.memory_space<vmem>>, %arg3: memref<9x9xf32, #tpu.memory_space<vmem>>, %arg4: memref<1x9xf32, #tpu.memory_space<vmem>>, %arg5: memref<1x9xf32, #tpu.memory_space<vmem>>, %arg6: memref<1x9xf32, #tpu.memory_space<vmem>>, %arg7: memref<2x8x9xf32, #tpu.memory_space<vmem>>) attributes {dimension_semantics = [], scalar_prefetch = 0 : i64, scratch_operands = 0 : i64, tpu.core_type = #tpu.core_type<tc>} {
    %c0 = arith.constant 0 : index
    %c0_0 = arith.constant 0 : index
    %c0_1 = arith.constant 0 : index
    %0 = vector.load %arg0[%c0, %c0_0, %c0_1] : memref<2x8x9xf32, #tpu.memory_space<vmem>>, vector<2x8x9xf32>
    %1 = vector.shape_cast %0 : vector<2x8x9xf32> to vector<16x9xf32>
    %c0_2 = arith.constant 0 : index
    %c0_3 = arith.constant 0 : index
    %2 = vector.load %arg1[%c0_2, %c0_3] : memref<9x9xf32, #tpu.memory_space<vmem>>, vector<9x9xf32>
    %cst = arith.constant dense<0.000000e+00> : vector<16x9xf32>
    %3 = tpu.matmul %1, %2, %cst {dimension_numbers = #tpu.dot_dimension_numbers<[1], [0], [0], [1], [0, 0, 1, 1], [], []>} : vector<16x9xf32>, vector<9x9xf32>, vector<16x9xf32> -> vector<16x9xf32>
    %c0_4 = arith.constant 0 : index
    %c0_5 = arith.constant 0 : index
    %4 = vector.load %arg4[%c0_4, %c0_5] : memref<1x9xf32, #tpu.memory_space<vmem>>, vector<1x9xf32>
    %5 = vector.broadcast %4 : vector<1x9xf32> to vector<16x9xf32>
    %6 = arith.addf %3, %5 : vector<16x9xf32>
    %c0_6 = arith.constant 0 : index
    %c0_7 = arith.constant 0 : index
    %7 = vector.load %arg2[%c0_6, %c0_7] : memref<9x9xf32, #tpu.memory_space<vmem>>, vector<9x9xf32>
    %cst_8 = arith.constant dense<0.000000e+00> : vector<16x9xf32>
    %8 = tpu.matmul %1, %7, %cst_8 {dimension_numbers = #tpu.dot_dimension_numbers<[1], [0], [0], [1], [0, 0, 1, 1], [], []>} : vector<16x9xf32>, vector<9x9xf32>, vector<16x9xf32> -> vector<16x9xf32>
    %c0_9 = arith.constant 0 : index
    %c0_10 = arith.constant 0 : index
    %9 = vector.load %arg5[%c0_9, %c0_10] : memref<1x9xf32, #tpu.memory_space<vmem>>, vector<1x9xf32>
    %10 = vector.broadcast %9 : vector<1x9xf32> to vector<16x9xf32>
    %11 = arith.addf %8, %10 : vector<16x9xf32>
    %c0_11 = arith.constant 0 : index
    %c0_12 = arith.constant 0 : index
    %12 = vector.load %arg3[%c0_11, %c0_12] : memref<9x9xf32, #tpu.memory_space<vmem>>, vector<9x9xf32>
    %cst_13 = arith.constant dense<0.000000e+00> : vector<16x9xf32>
    %13 = tpu.matmul %1, %12, %cst_13 {dimension_numbers = #tpu.dot_dimension_numbers<[1], [0], [0], [1], [0, 0, 1, 1], [], []>} : vector<16x9xf32>, vector<9x9xf32>, vector<16x9xf32> -> vector<16x9xf32>
    %c0_14 = arith.constant 0 : index
    %c0_15 = arith.constant 0 : index
    %14 = vector.load %arg6[%c0_14, %c0_15] : memref<1x9xf32, #tpu.memory_space<vmem>>, vector<1x9xf32>
    %15 = vector.broadcast %14 : vector<1x9xf32> to vector<16x9xf32>
    %16 = arith.addf %13, %15 : vector<16x9xf32>
    %17 = vector.shape_cast %6 : vector<16x9xf32> to vector<2x8x9xf32>
    %18 = vector.shape_cast %11 : vector<16x9xf32> to vector<2x8x9xf32>
    %19 = vector.shape_cast %16 : vector<16x9xf32> to vector<2x8x9xf32>
    "tpu.trace_start"() <{level = 10 : i32, message = "bqd,bkd->bqk"}> : () -> ()
    %cst_16 = arith.constant dense<0.000000e+00> : vector<2x8x8xf32>
    %20 = tpu.matmul %17, %18, %cst_16 {dimension_numbers = #tpu.dot_dimension_numbers<[2], [2], [1], [1], [0, 0, 0, 1, 1, 1], [0], [0]>} : vector<2x8x9xf32>, vector<2x8x9xf32>, vector<2x8x8xf32> -> vector<2x8x8xf32>
    "tpu.trace_stop"() : () -> ()
    %cst_17 = arith.constant dense<0xFF800000> : vector<2x8xf32>
    %21 = vector.multi_reduction <maximumf>, %20, %cst_17 [2] : vector<2x8x8xf32> to vector<2x8xf32>
    %22 = vector.shape_cast %21 : vector<2x8xf32> to vector<2x8x1xf32>
    %23 = vector.broadcast %22 : vector<2x8x1xf32> to vector<2x8x8xf32>
    %24 = arith.subf %20, %23 : vector<2x8x8xf32>
    %25 = math.exp %24 : vector<2x8x8xf32>
    %cst_18 = arith.constant dense<0.000000e+00> : vector<2x8xf32>
    %26 = vector.multi_reduction <add>, %25, %cst_18 [2] : vector<2x8x8xf32> to vector<2x8xf32>
    %27 = vector.shape_cast %26 : vector<2x8xf32> to vector<2x8x1xf32>
    "tpu.trace_start"() <{level = 10 : i32, message = "bqk,bkd->bqd"}> : () -> ()
    %cst_19 = arith.constant dense<0.000000e+00> : vector<2x8x9xf32>
    %28 = tpu.matmul %25, %19, %cst_19 {dimension_numbers = #tpu.dot_dimension_numbers<[2], [1], [1], [2], [0, 0, 0, 1, 1, 2], [0], [0]>} : vector<2x8x8xf32>, vector<2x8x9xf32>, vector<2x8x9xf32> -> vector<2x8x9xf32>
    "tpu.trace_stop"() : () -> ()
    %29 = tpu.reciprocal %27 {approx = true} : vector<2x8x1xf32> -> vector<2x8x1xf32>
    %30 = arith.mulf %27, %29 : vector<2x8x1xf32>
    %cst_20 = arith.constant 2.000000e+00 : f32
    %31 = vector.broadcast %cst_20 : f32 to vector<2x8x1xf32>
    %32 = arith.subf %31, %30 : vector<2x8x1xf32>
    %33 = arith.mulf %29, %32 : vector<2x8x1xf32>
    %34 = vector.broadcast %33 : vector<2x8x1xf32> to vector<2x8x9xf32>
    %35 = arith.mulf %28, %34 : vector<2x8x9xf32>
    %c0_21 = arith.constant 0 : index
    %c0_22 = arith.constant 0 : index
    %c0_23 = arith.constant 0 : index
    %36 = vector.load %arg7[%c0_21, %c0_22, %c0_23] : memref<2x8x9xf32, #tpu.memory_space<vmem>>, vector<2x8x9xf32>
    tpu.vector_store %arg7[%c0_21, %c0_22, %c0_23], %35 {strides = array<i32>} : memref<2x8x9xf32, #tpu.memory_space<vmem>>, vector<2x8x9xf32>,
    return
  }
}

</mosaic_0001>

<bundles_post_ra>
// kernel: tpu_custom_call.1
= control target key start
LH: loop header
LB: loop body
LE: loop exit
PB: predicated region body
PF: predicated region fallthrough
CT: control target
= control target key end

     0   :  { %12 = vsyncpa [#allocation3], 0  ;;  %s614_s0 = inlined_call_operand.hbm [shape: f32[2,8,9], index: 0, kind: input, shape index: {}]   ;;  %s615_s1 = inlined_call_operand.hbm [shape: f32[9,9], index: 1, kind: input, shape index: {}]   ;;  %s616_s2 = inlined_call_operand.hbm [shape: f32[9,9], index: 2, kind: input, shape index: {}]   ;;  %s617_s3 = inlined_call_operand.hbm [shape: f32[9,9], index: 3, kind: input, shape index: {}]   ;;  %s618_s4 = inlined_call_operand.vmem [shape: f32[1,9], index: 4, kind: input, shape index: {}]   ;;  %s619_s5 = inlined_call_operand.vmem [shape: f32[1,9], index: 5, kind: input, shape index: {}]   ;;  %s620_s6 = inlined_call_operand.vmem [shape: f32[1,9], index: 6, kind: input, shape index: {}]   ;;  %s621_s7 = inlined_call_operand.hbm [shape: f32[2,8,9], index: 7, kind: output, shape index: {}]  }
   0x1   :  { %13 = vsyncpa [#allocation6], 0 }
   0x2   :  { %14 = vsyncpa [#allocation9], 0 }
   0x3   :  { %15 = vsyncpa [#allocation4], 0  ;;  %s33_s26 = sshll.u32 %s615_s1, 4  ;;  %s507_s27 = smov [#allocation5]   ;;  %s34_s26 = int_to_ptr.hbm [resolvable:$true] %s33_s26 }
   0x4   :  { %s35_s28 = sshll.u32 %s507_s27, 4  ;;  %s20_s8 = sshll.u32 %s614_s0, 4  ;;  %s36_s28 = int_to_ptr.vmem [resolvable:$true] %s35_s28  ;;  %s21_s8 = int_to_ptr.hbm [resolvable:$true] %s20_s8 }
   0x5   :  { %s508_s9 = smov 128   ;;  %s509_s10 = smov 8  }
   0x6   :  { %41 = dma.hbm_to_vmem [thread:$0]  %s34_s26, 256, %s36_s28, [#allocation6], %s508_s9, %s508_s9, %s509_s10  }
   0x7   :  { %s510_s11 = smov [#allocation2]   ;;  %s46_s1 = sshll.u32 %s616_s2, 4  ;;  %s47_s1 = int_to_ptr.hbm [resolvable:$true] %s46_s1 }
   0x8   :  { %s22_s12 = sshll.u32 %s510_s11, 4  ;;  %s59_s16 = sshll.u32 %s617_s3, 4  ;;  %s23_s12 = int_to_ptr.vmem [resolvable:$true] %s22_s12  ;;  %s60_s16 = int_to_ptr.hbm [resolvable:$true] %s59_s16 }
   0x9   :  { %28 = dma.hbm_to_vmem [thread:$0]  %s21_s8, 256, %s23_s12, [#allocation3], %s508_s9, %s508_s9, %s509_s10  }
   0xa   :  { %s511_s17 = smov [#allocation7]   ;;  %s512_s19 = smov [#allocation8]  }
   0xb   :  { %s48_s18 = sshll.u32 %s511_s17, 4  ;;  %s61_s2 = sshll.u32 %s512_s19, 4  ;;  %s49_s18 = int_to_ptr.vmem [resolvable:$true] %s48_s18  ;;  %s62_s2 = int_to_ptr.vmem [resolvable:$true] %s61_s2 }
   0xc   :  { %54 = dma.hbm_to_vmem [thread:$0]  %s47_s1, 256, %s49_s18, [#allocation6], %s508_s9, %s508_s9, %s509_s10  }
   0xd   :  { %67 = dma.hbm_to_vmem [thread:$0]  %s60_s16, 256, %s62_s2, [#allocation9], %s508_s9, %s508_s9, %s509_s10  }
   0xe   :  { %499 = dma.done.wait [#allocation3], 256  }
   0xf   :  { %500 = vsyncadd [#allocation3], 4294967040 }
  0x10   :  { %501 = dma.done.wait [#allocation6], 512  }
  0x11   :  { %502 = vsyncadd [#allocation6], 4294966784 }
  0x12   :  { %503 = dma.done.wait [#allocation9], 256  }
  0x13   :  { %504 = vsyncadd [#allocation9], 4294967040  ;;  %vm105_vm0 = vcmask 1040384   ;;  %v133_v0 = vld [vmem:[#allocation7 + $0x8] sm:$0x1]  ;;  %v132_v1 = vld [vmem:[#allocation7] sm:$0xff] }
  0x14   :  { %v93_v2 = vld [vmem:[#allocation5 + $0x8] sm:$0x1]  ;;  %349 = vmatpush.msk.msra.mxu1 %vm105_vm0, %v133_v0  ;;  %v90_v3 = vld [vmem:[#allocation2] sm:$0xff]  ;;  %vm98_vm1 = vcmask 72704   ;;  %v92_v4 = vld [vmem:[#allocation5] sm:$0xff]  ;;  %vm248_vm2 = vcmask 64512  }
  0x15   :  { %346 = vmatpush.msk.msra.mxu0 %vm105_vm0, %v93_v2  ;;  %v91_v5 = vld [vmem:[#allocation2 + $0x8] sm:$0xff]  ;;  %v165_v6 = vld [vmem:[#allocation8 + $0x8] sm:$0x1]  ;;  %v164_v7 = vld [vmem:[#allocation8] sm:$0xff]  ;;  %s331_s26 = sshll.u32 %s621_s7, 4  ;;  %s332_s26 = int_to_ptr.hbm [resolvable:$true] %s331_s26 }
  0x16   :  { %156 = vmatpush.msra.mxu1 %v132_v1  ;;  %352 = vmatpush.msk.msra.mxu2 %vm105_vm0, %v165_v6  ;;  %v368_v8 = vld [vmem:[%s619_s5] ss:$0 sm:$0xff] }
  0x17   :  { %124 = vmatpush.msra.mxu0 %v92_v4  ;;  %350 = vmatmul.msk.f32.vlgmr.msra.gmra.mxu1 %vm98_vm1, %v90_v3  ;;  %v369_v9 = vld [vmem:[%s618_s4] ss:$0 sm:$0xff] }
  0x18   :  { %347 = vmatmul.msk.f32.vlgmr.msra.gmra.mxu0 %vm98_vm1, %v90_v3  ;;  %188 = vmatpush.msra.mxu2 %v164_v7  ;;  %v370_v22 = vld [vmem:[%s620_s6] ss:$0 sm:$0xff]  ;;  %s513_s6 = smov [#allocation10]  }
  0x19   :  { %353 = vmatmul.msk.f32.vlgmr.msra.gmra.mxu2 %vm98_vm1, %v90_v3  ;;  %s329_s23 = sshll.u32 %s513_s6, 4  ;;  %s330_s23 = int_to_ptr.vmem [resolvable:$true] %s329_s23 }
  0x1f   :  { %351 = vmatmul.msk.f32.gmra.mxu1 %vm98_vm1, %v91_v5 }
  0x20   :  { %348 = vmatmul.msk.f32.gmra.mxu0 %vm98_vm1, %v91_v5 }
  0x21   :  { %354 = vmatmul.msk.f32.gmra.mxu2 %vm98_vm1, %v91_v5 }
  0x94   :  { %v158_v10 = vpop.f32.mrf.mxu1 }
  0x95   :  { %v126_v11 = vpop.f32.mrf.mxu0  ;;  %v159_v12 = vadd.f32 %v368_v8, %v158_v10 }
  0x96   :  { %v127_v13 = vadd.f32 %v369_v9, %v126_v11 }
  0x97   :  { %355 = vmatpush.xpose.msk.msra.mxu3 %vm98_vm1, %v159_v12 }
  0x9a   :  { %356 = vmatmul.msk.f32.vlgmr.msra.gmra.mxu3 %vm98_vm1, %v127_v13 }
  0x9c   :  { %v161_v14 = vpop.f32.mrf.mxu1  ;;  %v190_v23 = vpop.f32.mrf.mxu2 }
  0x9d   :  { %v129_v15 = vpop.f32.mrf.mxu0  ;;  %v162_v16 = vadd.f32 %v368_v8, %v161_v14  ;;  %v191_v24 = vadd.f32 %v370_v22, %v190_v23 }
  0x9e   :  { %v130_v17 = vadd.f32 %v369_v9, %v129_v15 }
  0x9f   :  { %357 = vmatpush.xpose.msk.msrb.mxu3 %vm98_vm1, %v162_v16  ;;  %285 = vmatpush.msrb.mxu0 %v191_v24 }
  0xa2   :  { %358 = vmatmul.msk.f32.vlgmr.msrb.gmra.mxu3 %vm98_vm1, %v130_v17 }
  0xa4   :  { %v193_v25 = vpop.f32.mrf.mxu2 }
  0xa5   :  { %v194_v26 = vadd.f32 %v370_v22, %v193_v25 }
  0xa7   :  { %308 = vmatpush.msrb.mxu1 %v194_v26 }
 0x11d   :  { %v219_v18 = vpop.f32.mrf.mxu3 }
 0x11e   :  { %v249_v19 = vsel %vm248_vm2, %v219_v18, -inf }
 0x11f   :  { %250 = vmax.xlane.f32.xlu0 %v249_v19 }
 0x125   :  { %v245_v20 = vpop.f32.mrf.mxu3 }
 0x126   :  { %v252_v21 = vsel %vm248_vm2, %v245_v20, -inf }
 0x127   :  { %253 = vmax.xlane.f32.xlu0 %v252_v21 }
 0x192   :  { %v251_v27 = vpop.xlane.xlu0 %250 }
 0x193   :  { %v255_v28 = vsub.f32 %v219_v18, %v251_v27 }
 0x195   :  { %v257_v29 = vmul.f32 1.442695, %v255_v28 }
 0x197   :  { %371 = vpow2.f32 %v257_v29 }
 0x19a   :  { %v254_v30 = vpop.xlane.xlu0 %253 }
 0x19b   :  { %v256_v31 = vsub.f32 %v245_v20, %v254_v30 }
 0x19d   :  { %v372_v32 = vpop.eup %371  ;;  %v259_v33 = vmul.f32 1.442695, %v256_v31 }
 0x19e   :  { %359 = vmatmul.msk.f32.vlgmr.msrb.gmra.mxu0 %vm248_vm2, %v372_v32  ;;  %v261_v34 = vsel %vm248_vm2, %v372_v32, 0.0 }
 0x19f   :  { %373 = vpow2.f32 %v259_v33  ;;  %262 = vadd.xlane.f32.xlu1 %v261_v34 }
 0x1a5   :  { %v374_v35 = vpop.eup %373 }
 0x1a6   :  { %360 = vmatmul.msk.f32.vlgmr.msrb.gmra.mxu1 %vm248_vm2, %v374_v35  ;;  %v264_v36 = vsel %vm248_vm2, %v374_v35, 0.0 }
 0x1a7   :  { %265 = vadd.xlane.f32.xlu1 %v264_v36 }
 0x212   :  { %v263_v37 = vpop.xlane.xlu1 %262 }
 0x213   :  { %375 = vrcp.f32 %v263_v37 }
 0x219   :  { %v376_v38 = vpop.eup %375 }
 0x21a   :  { %v315_v39 = vmul.f32 %v376_v38, %v263_v37  ;;  %v266_v40 = vpop.xlane.xlu1 %265 }
 0x21b   :  { %377 = vrcp.f32 %v266_v40  ;;  %v287_v43 = vpop.f32.mrf.mxu0 }
 0x21c   :  { %v317_v41 = vsub.f32 2.0, %v315_v39 }
 0x21e   :  { %v319_v42 = vmul.f32 %v376_v38, %v317_v41 }
 0x220   :  { %v321_v44 = vmul.f32 %v319_v42, %v287_v43 }
 0x221   :  { %v378_v45 = vpop.eup %377 }
 0x222   :  { %v316_v46 = vmul.f32 %v378_v45, %v266_v40  ;;  %323 = vst.msk [vmem:[#allocation10] sm:$0xff] %vm98_vm1, %v321_v44 }
 0x223   :  { %v310_v49 = vpop.f32.mrf.mxu1 }
 0x224   :  { %v318_v47 = vsub.f32 2.0, %v316_v46 }
 0x226   :  { %v320_v48 = vmul.f32 %v378_v45, %v318_v47 }
 0x228   :  { %v322_v50 = vmul.f32 %v320_v48, %v310_v49 }
 0x22a   :  { %324 = vst.msk [vmem:[#allocation10 + $0x8] sm:$0xff] %vm98_vm1, %v322_v50 }
 0x22b   :  { %337 = dma.vmem_to_hbm [thread:$0]  %s330_s23, 256, %s332_s26, [#allocation4], %s508_s9, %s508_s9, %s509_s10  }
 0x22c   :  { %505 = dma.done.wait [#allocation4], 256  }
 0x22d   :  { %506 = vsyncadd [#allocation4], 4294967040 }
 0x22e   :  { %342 = vsyncpa [#allocation3], 1 }
 0x22f   :  { %343 = vsyncpa [#allocation6], 1 }
 0x230   :  { %344 = vsyncpa [#allocation9], 1 }
 0x231   :  { %345 = vsyncpa [#allocation4], 1 }

</bundles_post_ra>
